<compile_context>
chip_gen: v5e
topology: v5e:2x2
jax: 0.10.0
libtpu: 0.0.40
codegen_flags: <defaults>
</compile_context>

<pallas_src>
import jax
import jax.numpy as jnp
from jax.experimental import pallas as pl
from jax.experimental.pallas import tpu as pltpu


def _round_up(x, m):
    return ((x + m - 1) // m) * m


_TILE_CAP = 2048  # rows per grid step (VMEM per step stays < ~3 MiB)


def _mlp_kernel(x_ref, *refs):
    """refs = (w0, b0, w1, b1, ..., wL, bL, out_ref).

    x is f32 (cast to bf16 here), w are bf16, b are f32.  Dots accumulate in
    f32; bias add + tanh in f32.  Hidden layers use tanh; final layer linear.
    """
    out_ref = refs[-1]
    wb_refs = refs[:-1]
    num_linear = len(wb_refs) // 2

    # Fused f32 -> bf16 cast of the input tile (no separate HBM cast pass).
    h = x_ref[...].astype(jnp.bfloat16)
    for li in range(num_linear):
        w = wb_refs[2 * li][...]          # bf16 (d_in_k, d_out_k)
        b = wb_refs[2 * li + 1][...]      # f32  (1, d_out_k)
        z = jnp.dot(h, w, preferred_element_type=jnp.float32) + b
        if li < num_linear - 1:
            h = jnp.tanh(z).astype(jnp.bfloat16)
        else:
            out_ref[...] = z.astype(out_ref.dtype)


def _choose_batch_tiling(B, batch_tile):
    """Pick (batch_tile, n_steps) with 128-row alignment and even step count."""
    if batch_tile is not None:
        batch_tile = max(16, _round_up(batch_tile, 16))
        n_steps = pl.cdiv(B, batch_tile)
        return batch_tile, n_steps

    B_pad = _round_up(B, 128)
    n_steps = max(1, pl.cdiv(B_pad, _TILE_CAP))
    # Even step count when >=2 tiles of work exist: keeps both v7x TCs busy;
    # costs one extra ~0.35us grid step on single-TC v5e/v6e (negligible).
    if B_pad >= 256 and n_steps % 2 == 1:
        n_steps += 1
    batch_tile = _round_up(pl.cdiv(B_pad, n_steps), 128)
    return batch_tile, n_steps


def _pad_hidden_dims(weights, biases):
    """Zero-pad hidden widths to multiples of 128 lanes (numerically exact)."""
    num = len(weights)
    w_out, b_out = [], []
    for li, (w, b) in enumerate(zip(weights, biases)):
        fin, fout = w.shape
        fin_p = fin if li == 0 else _round_up(fin, 128)        # input dim of layer
        fout_p = fout if li == num - 1 else _round_up(fout, 128)  # hidden width
        w_out.append(jnp.pad(w, ((0, fin_p - fin), (0, fout_p - fout))))
        b_out.append(jnp.pad(b, ((0, 0), (0, fout_p - fout))))
    return w_out, b_out


def pcanet_forward(x, weights, biases, *, batch_tile=None):
    """PCANet (MLP) forward with one fused Pallas kernel.

    Args:
      x:       (B, D_in) float32 input.
      weights: list of (D_in_k, D_out_k) float32 matrices (already transposed
               relative to PyTorch's (out, in) storage).
      biases:  list of (1, D_out_k) float32 rows.
      batch_tile: optional rows of X per grid step (rounded up to 16).
    Returns:
      (B, D_out) float32 output.
    """
    B, d_in = x.shape
    d_out = weights[-1].shape[1]

    # ---- batch tiling: 128-row aligned tiles, even step count when possible.
    batch_tile, n_steps = _choose_batch_tiling(B, batch_tile)
    B_pad = batch_tile * n_steps
    if B_pad != B:
        x = jnp.pad(x, ((0, B_pad - B), (0, 0)))

    # ---- lane-dense hidden layers (exact zero padding); output width stays
    #      d_out so HBM writeback is not inflated.
    weights, biases = _pad_hidden_dims(list(weights), list(biases))

    # ---- bf16 matmul weights (one-time, tiny); x stays f32 (cast in-kernel).
    weights_bf = [w.astype(jnp.bfloat16) for w in weights]
    biases_f32 = [b.astype(jnp.float32) for b in biases]

    # ---- operands + BlockSpecs (weights/biases: whole-array, constant index).
    wb = []
    wb_specs = []
    for w, b in zip(weights_bf, biases_f32):
        wb.append(w)
        wb_specs.append(pl.BlockSpec(w.shape, lambda i: (0, 0)))
        wb.append(b)
        wb_specs.append(pl.BlockSpec(b.shape, lambda i: (0, 0)))

    # ---- cost estimate for the XLA scheduler.
    flops = 2 * B_pad * sum(w.shape[0] * w.shape[1] for w in weights_bf)
    transcendentals = B_pad * sum(w.shape[1] for w in weights_bf[:-1])
    bytes_accessed = (
        x.size * 4
        + sum(w.size * 2 for w in weights_bf)
        + sum(b.size * 4 for b in biases_f32)
        + B_pad * d_out * 4
    )
    cost = pl.CostEstimate(
        flops=flops,
        transcendentals=transcendentals,
        bytes_accessed=bytes_accessed,
    )

    out = pl.pallas_call(
        _mlp_kernel,
        out_shape=jax.ShapeDtypeStruct((B_pad, d_out), jnp.float32),
        grid_spec=pltpu.PrefetchScalarGridSpec(
            num_scalar_prefetch=0,
            grid=(n_steps,),
            in_specs=[pl.BlockSpec((batch_tile, d_in), lambda i: (i, 0))]
            + wb_specs,
            out_specs=pl.BlockSpec((batch_tile, d_out), lambda i: (i, 0)),
        ),
        compiler_params=pltpu.CompilerParams(
            dimension_semantics=("parallel",),
        ),
        cost_estimate=cost,
    )(x, *wb)

    if B_pad != B:
        out = out[:B]
    return out


def init_mlp_params(key, num_layers, num_neurons, num_inp_red_dim,
                    num_out_red_dim):
    """Deterministic init mimicking torch.nn.Linear (uniform +/- 1/sqrt(fan_in)).

    Returns weights already transposed to (in, out) layout and biases as (1, out).
    """
    dims = ([num_inp_red_dim]
            + [num_neurons] * num_layers
            + [num_out_red_dim])
    weights, biases = [], []
    for fan_in, fan_out in zip(dims[:-1], dims[1:]):
        key, kw, kb = jax.random.split(key, 3)
        bound = 1.0 / jnp.sqrt(jnp.float32(fan_in))
        w = jax.random.uniform(kw, (fan_in, fan_out), jnp.float32,
                               minval=-bound, maxval=bound)
        b = jax.random.uniform(kb, (1, fan_out), jnp.float32,
                               minval=-bound, maxval=bound)
        weights.append(w)
        biases.append(b)
    return weights, biases


def reference_forward_bf16(x, weights, biases):
    """Mirrors the kernel's dtype path (bf16 operands, f32 accumulate/tanh)."""
    h = x.astype(jnp.bfloat16)
    for li, (w, b) in enumerate(zip(weights, biases)):
        h = jnp.dot(h, w.astype(jnp.bfloat16),
                    preferred_element_type=jnp.float32) + b
        if li < len(weights) - 1:
            h = jnp.tanh(h).astype(jnp.bfloat16)
    return h


def reference_forward_f32(x, weights, biases):
    """Pure f32 reference (original module semantics)."""
    h = x
    for li, (w, b) in enumerate(zip(weights, biases)):
        h = h @ w + b
        if li < len(weights) - 1:
            h = jnp.tanh(h)
    return h


if __name__ == "__main__":
    # Small PCANet config: depth=3 hidden layers, 64 neurons, 32->16 reduced
    # dims.  Batch of 200 (not a tile multiple) exercises the ragged path.
    num_layers = 3
    num_neurons = 64
    num_inp_red_dim = 32
    num_out_red_dim = 16
    batch = 200

    key = jax.random.PRNGKey(0)
    key, kx = jax.random.split(key)
    x = jax.random.normal(kx, (batch, num_inp_red_dim), jnp.float32)

    weights, biases = init_mlp_params(
        key, num_layers, num_neurons, num_inp_red_dim, num_out_red_dim)

    y = pcanet_forward(x, weights, biases)
    y = jax.block_until_ready(y)
    assert y.shape == (batch, num_out_red_dim)

    # Tight check against a reference that mirrors the kernel's bf16 path
    # (hidden-dim zero padding in the kernel is numerically exact).
    y_ref_bf = reference_forward_bf16(x, weights, biases)
    assert jnp.allclose(y, y_ref_bf, atol=1e-4, rtol=1e-4), \
        "mismatch vs bf16-path reference"

    # Loose sanity check against the original f32 module semantics.
    y_ref_f32 = reference_forward_f32(x, weights, biases)
    assert jnp.allclose(y, y_ref_f32, atol=5e-2, rtol=5e-2), \
        "mismatch vs f32 reference"

    print("KERNEL_OK")
</pallas_src>

<mosaic_0001>
module attributes {stable_mosaic.version = 11 : i64} {
  func.func @_mlp_kernel(%arg0: i32, %arg1: memref<128x32xf32, #tpu.memory_space<vmem>>, %arg2: memref<32x128xbf16, #tpu.memory_space<vmem>>, %arg3: memref<1x128xf32, #tpu.memory_space<vmem>>, %arg4: memref<128x128xbf16, #tpu.memory_space<vmem>>, %arg5: memref<1x128xf32, #tpu.memory_space<vmem>>, %arg6: memref<128x128xbf16, #tpu.memory_space<vmem>>, %arg7: memref<1x128xf32, #tpu.memory_space<vmem>>, %arg8: memref<128x16xbf16, #tpu.memory_space<vmem>>, %arg9: memref<1x16xf32, #tpu.memory_space<vmem>>, %arg10: memref<128x16xf32, #tpu.memory_space<vmem>>) attributes {dimension_semantics = [#tpu.dimension_semantics<parallel>], iteration_bounds = array<i64: 2>, scalar_prefetch = 0 : i64, scratch_operands = 0 : i64, tpu.core_type = #tpu.core_type<tc>, window_params = [{transform_indices = @transform_0, window_bounds = array<i64: 128, 32>}, {pipeline_mode = #tpu.pipeline_mode<synchronous>, transform_indices = @transform_1, window_bounds = array<i64: 32, 128>}, {pipeline_mode = #tpu.pipeline_mode<synchronous>, transform_indices = @transform_2, window_bounds = array<i64: 1, 128>}, {pipeline_mode = #tpu.pipeline_mode<synchronous>, transform_indices = @transform_3, window_bounds = array<i64: 128, 128>}, {pipeline_mode = #tpu.pipeline_mode<synchronous>, transform_indices = @transform_4, window_bounds = array<i64: 1, 128>}, {pipeline_mode = #tpu.pipeline_mode<synchronous>, transform_indices = @transform_5, window_bounds = array<i64: 128, 128>}, {pipeline_mode = #tpu.pipeline_mode<synchronous>, transform_indices = @transform_6, window_bounds = array<i64: 1, 128>}, {pipeline_mode = #tpu.pipeline_mode<synchronous>, transform_indices = @transform_7, window_bounds = array<i64: 128, 16>}, {pipeline_mode = #tpu.pipeline_mode<synchronous>, transform_indices = @transform_8, window_bounds = array<i64: 1, 16>}, {transform_indices = @transform_9, window_bounds = array<i64: 128, 16>}]} {
    %c0 = arith.constant 0 : index
    %c0_0 = arith.constant 0 : index
    %0 = vector.load %arg1[%c0, %c0_0] : memref<128x32xf32, #tpu.memory_space<vmem>>, vector<128x32xf32>
    %1 = arith.truncf %0 : vector<128x32xf32> to vector<128x32xbf16>
    %c0_1 = arith.constant 0 : index
    %c0_2 = arith.constant 0 : index
    %2 = vector.load %arg2[%c0_1, %c0_2] : memref<32x128xbf16, #tpu.memory_space<vmem>>, vector<32x128xbf16>
    %c0_3 = arith.constant 0 : index
    %c0_4 = arith.constant 0 : index
    %3 = vector.load %arg3[%c0_3, %c0_4] : memref<1x128xf32, #tpu.memory_space<vmem>>, vector<1x128xf32>
    %cst = arith.constant dense<0.000000e+00> : vector<128x128xf32>
    %4 = tpu.matmul %1, %2, %cst {dimension_numbers = #tpu.dot_dimension_numbers<[1], [0], [0], [1], [0, 0, 1, 1], [], []>} : vector<128x32xbf16>, vector<32x128xbf16>, vector<128x128xf32> -> vector<128x128xf32>
    %5 = vector.broadcast %3 : vector<1x128xf32> to vector<128x128xf32>
    %6 = arith.addf %4, %5 : vector<128x128xf32>
    %7 = math.tanh %6 : vector<128x128xf32>
    %8 = arith.truncf %7 : vector<128x128xf32> to vector<128x128xbf16>
    %c0_5 = arith.constant 0 : index
    %c0_6 = arith.constant 0 : index
    %9 = vector.load %arg4[%c0_5, %c0_6] : memref<128x128xbf16, #tpu.memory_space<vmem>>, vector<128x128xbf16>
    %c0_7 = arith.constant 0 : index
    %c0_8 = arith.constant 0 : index
    %10 = vector.load %arg5[%c0_7, %c0_8] : memref<1x128xf32, #tpu.memory_space<vmem>>, vector<1x128xf32>
    %cst_9 = arith.constant dense<0.000000e+00> : vector<128x128xf32>
    %11 = tpu.matmul %8, %9, %cst_9 {dimension_numbers = #tpu.dot_dimension_numbers<[1], [0], [0], [1], [0, 0, 1, 1], [], []>} : vector<128x128xbf16>, vector<128x128xbf16>, vector<128x128xf32> -> vector<128x128xf32>
    %12 = vector.broadcast %10 : vector<1x128xf32> to vector<128x128xf32>
    %13 = arith.addf %11, %12 : vector<128x128xf32>
    %14 = math.tanh %13 : vector<128x128xf32>
    %15 = arith.truncf %14 : vector<128x128xf32> to vector<128x128xbf16>
    %c0_10 = arith.constant 0 : index
    %c0_11 = arith.constant 0 : index
    %16 = vector.load %arg6[%c0_10, %c0_11] : memref<128x128xbf16, #tpu.memory_space<vmem>>, vector<128x128xbf16>
    %c0_12 = arith.constant 0 : index
    %c0_13 = arith.constant 0 : index
    %17 = vector.load %arg7[%c0_12, %c0_13] : memref<1x128xf32, #tpu.memory_space<vmem>>, vector<1x128xf32>
    %cst_14 = arith.constant dense<0.000000e+00> : vector<128x128xf32>
    %18 = tpu.matmul %15, %16, %cst_14 {dimension_numbers = #tpu.dot_dimension_numbers<[1], [0], [0], [1], [0, 0, 1, 1], [], []>} : vector<128x128xbf16>, vector<128x128xbf16>, vector<128x128xf32> -> vector<128x128xf32>
    %19 = vector.broadcast %17 : vector<1x128xf32> to vector<128x128xf32>
    %20 = arith.addf %18, %19 : vector<128x128xf32>
    %21 = math.tanh %20 : vector<128x128xf32>
    %22 = arith.truncf %21 : vector<128x128xf32> to vector<128x128xbf16>
    %c0_15 = arith.constant 0 : index
    %c0_16 = arith.constant 0 : index
    %23 = vector.load %arg8[%c0_15, %c0_16] : memref<128x16xbf16, #tpu.memory_space<vmem>>, vector<128x16xbf16>
    %c0_17 = arith.constant 0 : index
    %c0_18 = arith.constant 0 : index
    %24 = vector.load %arg9[%c0_17, %c0_18] : memref<1x16xf32, #tpu.memory_space<vmem>>, vector<1x16xf32>
    %cst_19 = arith.constant dense<0.000000e+00> : vector<128x16xf32>
    %25 = tpu.matmul %22, %23, %cst_19 {dimension_numbers = #tpu.dot_dimension_numbers<[1], [0], [0], [1], [0, 0, 1, 1], [], []>} : vector<128x128xbf16>, vector<128x16xbf16>, vector<128x16xf32> -> vector<128x16xf32>
    %26 = vector.broadcast %24 : vector<1x16xf32> to vector<128x16xf32>
    %27 = arith.addf %25, %26 : vector<128x16xf32>
    %c0_20 = arith.constant 0 : index
    %c0_21 = arith.constant 0 : index
    %28 = vector.load %arg10[%c0_20, %c0_21] : memref<128x16xf32, #tpu.memory_space<vmem>>, vector<128x16xf32>
    tpu.vector_store %arg10[%c0_20, %c0_21], %27 {strides = array<i32>} : memref<128x16xf32, #tpu.memory_space<vmem>>, vector<128x16xf32>,
    return
  }
  func.func @transform_0(%arg0: i32) -> (i32, i32) {
    %c0_i32 = arith.constant 0 : i32
    %c0_i32_0 = arith.constant 0 : i32
    return %arg0, %c0_i32 : i32, i32
  }
  func.func @transform_1(%arg0: i32) -> (i32, i32) {
    %c0_i32 = arith.constant 0 : i32
    %c0_i32_0 = arith.constant 0 : i32
    %c0_i32_1 = arith.constant 0 : i32
    return %c0_i32, %c0_i32_0 : i32, i32
  }
  func.func @transform_2(%arg0: i32) -> (i32, i32) {
    %c0_i32 = arith.constant 0 : i32
    %c0_i32_0 = arith.constant 0 : i32
    %c0_i32_1 = arith.constant 0 : i32
    return %c0_i32, %c0_i32_0 : i32, i32
  }
  func.func @transform_3(%arg0: i32) -> (i32, i32) {
    %c0_i32 = arith.constant 0 : i32
    %c0_i32_0 = arith.constant 0 : i32
    %c0_i32_1 = arith.constant 0 : i32
    return %c0_i32, %c0_i32_0 : i32, i32
  }
  func.func @transform_4(%arg0: i32) -> (i32, i32) {
    %c0_i32 = arith.constant 0 : i32
    %c0_i32_0 = arith.constant 0 : i32
    %c0_i32_1 = arith.constant 0 : i32
    return %c0_i32, %c0_i32_0 : i32, i32
  }
  func.func @transform_5(%arg0: i32) -> (i32, i32) {
    %c0_i32 = arith.constant 0 : i32
    %c0_i32_0 = arith.constant 0 : i32
    %c0_i32_1 = arith.constant 0 : i32
    return %c0_i32, %c0_i32_0 : i32, i32
  }
  func.func @transform_6(%arg0: i32) -> (i32, i32) {
    %c0_i32 = arith.constant 0 : i32
    %c0_i32_0 = arith.constant 0 : i32
    %c0_i32_1 = arith.constant 0 : i32
    return %c0_i32, %c0_i32_0 : i32, i32
  }
  func.func @transform_7(%arg0: i32) -> (i32, i32) {
    %c0_i32 = arith.constant 0 : i32
    %c0_i32_0 = arith.constant 0 : i32
    %c0_i32_1 = arith.constant 0 : i32
    return %c0_i32, %c0_i32_0 : i32, i32
  }
  func.func @transform_8(%arg0: i32) -> (i32, i32) {
    %c0_i32 = arith.constant 0 : i32
    %c0_i32_0 = arith.constant 0 : i32
    %c0_i32_1 = arith.constant 0 : i32
    return %c0_i32, %c0_i32_0 : i32, i32
  }
  func.func @transform_9(%arg0: i32) -> (i32, i32) {
    %c0_i32 = arith.constant 0 : i32
    %c0_i32_0 = arith.constant 0 : i32
    return %arg0, %c0_i32 : i32, i32
  }
}

</mosaic_0001>

<bundles_post_ra>
// kernel: tpu_custom_call.1
= control target key start
LH: loop header
LB: loop body
LE: loop exit
PB: predicated region body
PF: predicated region fallthrough
CT: control target
= control target key end

     0   :  { %s1266_s30 = smov 0   ;;  %s1494_s0 = inlined_call_operand.vmem [shape: f32[256,32], index: 0, kind: input, shape index: {}]   ;;  %s1495_s1 = inlined_call_operand.vmem [shape: bf16[32,128], index: 1, kind: input, shape index: {}]   ;;  %s1496_s2 = inlined_call_operand.vmem [shape: f32[1,128], index: 2, kind: input, shape index: {}]   ;;  %s1497_s3 = inlined_call_operand.vmem [shape: bf16[128,128], index: 3, kind: input, shape index: {}]   ;;  %s1498_s4 = inlined_call_operand.vmem [shape: f32[1,128], index: 4, kind: input, shape index: {}]   ;;  %s1499_s5 = inlined_call_operand.vmem [shape: bf16[128,128], index: 5, kind: input, shape index: {}]   ;;  %s1500_s6 = inlined_call_operand.vmem [shape: f32[1,128], index: 6, kind: input, shape index: {}]   ;;  %s1501_s7 = inlined_call_operand.vmem [shape: bf16[128,16], index: 7, kind: input, shape index: {}]   ;;  %s1502_s8 = inlined_call_operand.vmem [shape: f32[1,16], index: 8, kind: input, shape index: {}]   ;;  %s1503_s9 = inlined_call_operand.vmem [shape: f32[256,16], index: 9, kind: output, shape index: {}]  }
   0x1 LB: > { %s951_s10 = sadd.s32 4294967295, %s1214_s30   ;;  %p955_p0 = scmp.ge.s32.totalorder %s1214_s30, 1  ;;  %s1214_s30 = sphi %s1266_s30, %s19_s30  }
   0x2   : > { %p288_p1 = scmp.lt.s32.totalorder %s1214_s30, 3 }
   0x4   : > { %p289_p2 = pnand %p955_p0, %p288_p1 }
   0x5   : > { %s956_s13 = sshll.u32 (!%p289_p2), %s951_s10, 4 }
   0x6   : > { %292 = sbr.rel (%p289_p2) target bundleno = 715 (0x2cb), region = 56  ;;  %p325_p3 = scmp.lt.s32.totalorder (!%p289_p2), %s956_s13, 31 }
   0xb   : > { %v1075_v0 = vld [vmem:[%s1495_s1 + $0x8] sm:$0xff]  ;;  %v1074_v1 = vld [vmem:[%s1495_s1] sm:$0xff]  ;;  %s1505_s13 = smov (!%p325_p3, %s956_s13), 31  ;;  %vm381_vm0 = vcmask 261120   ;;  %v1083_v20 = vld [vmem:[%s1497_s3 + $0x38] sm:$0xff]  ;;  %vm878_vm1 = vcmask 130048  }
   0xc   : > { %412 = vmatpush.bf16.msra.mxu0 %v1075_v0  ;;  %s957_s16 = sshll.u32 %s1505_s13, 3  ;;  %547 = vmatpush.bf16.msra.mxu1 %v1083_v20  ;;  %v1082_v21 = vld [vmem:[%s1497_s3 + $0x30] sm:$0xff]  ;;  %v1081_v22 = vld [vmem:[%s1497_s3 + $0x28] sm:$0xff]  ;;  %v1080_v26 = vld [vmem:[%s1497_s3 + $0x20] sm:$0xff] }
   0xd   : > { %s1288_s19 = scalar_lea.vmem %s1494_s0, %s957_s16  ;;  %v1079_v27 = vld [vmem:[%s1497_s3 + $0x18] sm:$0xff]  ;;  %v1078_v28 = vld [vmem:[%s1497_s3 + $0x10] sm:$0xff]  ;;  %v1077_v29 = vld [vmem:[%s1497_s3 + $0x8] sm:$0xff]  ;;  %s1457_s24 = scalar_lea.vmem %s1503_s9, %s957_s16 }
   0xe   : > { %v337_v2 = vld [vmem:[%s1288_s19] sm:$0xff]  ;;  %v338_v3 = vld [vmem:[%s1288_s19 + $0x8] sm:$0xff]  ;;  %v339_v5 = vld [vmem:[%s1288_s19 + $0x10] sm:$0xff] }
   0xf   : > { %v353_v4 = vpack.c.bf16 %v338_v3, %v337_v2  ;;  %v340_v6 = vld [vmem:[%s1288_s19 + $0x18] sm:$0xff]  ;;  %v341_v8 = vld [vmem:[%s1288_s19 + $0x20] sm:$0xff]  ;;  %v342_v9 = vld [vmem:[%s1288_s19 + $0x28] sm:$0xff] }
  0x10   : > { %413 = vmatpush.bf16.msra.mxu0 %v1074_v1  ;;  %v354_v7 = vpack.c.bf16 %v340_v6, %v339_v5  ;;  %v355_v10 = vpack.c.bf16 %v342_v9, %v341_v8  ;;  %v343_v11 = vld [vmem:[%s1288_s19 + $0x30] sm:$0xff]  ;;  %v344_v12 = vld [vmem:[%s1288_s19 + $0x38] sm:$0xff]  ;;  %v345_v14 = vld [vmem:[%s1288_s19 + $0x40] sm:$0xff]  ;;  %548 = vmatpush.bf16.msra.mxu1 %v1082_v21 }
  0x11   : > { %v356_v13 = vpack.c.bf16 %v344_v12, %v343_v11  ;;  %v346_v15 = vld [vmem:[%s1288_s19 + $0x48] sm:$0xff]  ;;  %v347_v17 = vld [vmem:[%s1288_s19 + $0x50] sm:$0xff]  ;;  %v348_v18 = vld [vmem:[%s1288_s19 + $0x58] sm:$0xff] }
  0x12   : > { %v357_v16 = vpack.c.bf16 %v346_v15, %v345_v14  ;;  %v358_v19 = vpack.c.bf16 %v348_v18, %v347_v17  ;;  %v349_v23 = vld [vmem:[%s1288_s19 + $0x60] sm:$0xff]  ;;  %v350_v24 = vld [vmem:[%s1288_s19 + $0x68] sm:$0xff]  ;;  %v351_v30 = vld [vmem:[%s1288_s19 + $0x70] sm:$0xff] }
  0x13   : > { %968 = vmatmul.msk.bf16.vlgmr.msra.gmra.mxu0 %vm381_vm0, %v353_v4  ;;  %v359_v25 = vpack.c.bf16 %v350_v24, %v349_v23  ;;  %v352_v31 = vld [vmem:[%s1288_s19 + $0x78] sm:$0xff]  ;;  %v1076_v33 = vld [vmem:[%s1497_s3] sm:$0xff] }
  0x14   : > { %549 = vmatpush.bf16.msra.mxu1 %v1081_v22  ;;  %v360_v32 = vpack.c.bf16 %v352_v31, %v351_v30  ;;  %v1341_v35 = vld [vmem:[%s1496_s2] ss:$0 sm:$0xff]  ;;  %v1091_v14 = vld [vmem:[%s1499_s5 + $0x38] sm:$0xff]  ;;  %v1085_v30 = vld [vmem:[%s1499_s5 + $0x8] sm:$0xff] }
  0x15   : > { %688 = vmatpush.bf16.msra.mxu2 %v1091_v14  ;;  %v1088_v22 = vld [vmem:[%s1499_s5 + $0x20] sm:$0xff] }
  0x18   : > { %550 = vmatpush.bf16.msra.mxu1 %v1080_v26 }
  0x1c   : > { %551 = vmatpush.bf16.msra.mxu1 %v1079_v27 }
  0x20   : > { %552 = vmatpush.bf16.msra.mxu1 %v1078_v28  ;;  %v1086_v28 = vld [vmem:[%s1499_s5 + $0x10] sm:$0xff] }
  0x23   : > { %969 = vmatmul.msk.bf16.gmra.mxu0 %vm381_vm0, %v354_v7 }
  0x24   : > { %553 = vmatpush.bf16.msra.mxu1 %v1077_v29 }
  0x28   : > { %554 = vmatpush.bf16.msra.mxu1 %v1076_v33 }
  0x33   : > { %970 = vmatmul.msk.bf16.gmra.mxu0 %vm381_vm0, %v355_v10 }
  0x43   : > { %971 = vmatmul.msk.bf16.gmra.mxu0 %vm381_vm0, %v356_v13 }
  0x53   : > { %972 = vmatmul.msk.bf16.gmra.mxu0 %vm381_vm0, %v357_v16  ;;  %v1090_v16 = vld [vmem:[%s1499_s5 + $0x30] sm:$0xff] }
  0x54   : > { %689 = vmatpush.bf16.msra.mxu2 %v1090_v16 }
  0x63   : > { %973 = vmatmul.msk.bf16.gmra.mxu0 %vm381_vm0, %v358_v19  ;;  %v1089_v19 = vld [vmem:[%s1499_s5 + $0x28] sm:$0xff] }
  0x64   : > { %690 = vmatpush.bf16.msra.mxu2 %v1089_v19 }
  0x68   : > { %691 = vmatpush.bf16.msra.mxu2 %v1088_v22 }
  0x73   : > { %974 = vmatmul.msk.bf16.gmra.mxu0 %vm381_vm0, %v359_v25  ;;  %v1087_v25 = vld [vmem:[%s1499_s5 + $0x18] sm:$0xff] }
  0x74   : > { %692 = vmatpush.bf16.msra.mxu2 %v1087_v25 }
  0x78   : > { %693 = vmatpush.bf16.msra.mxu2 %v1086_v28 }
  0x7c   : > { %694 = vmatpush.bf16.msra.mxu2 %v1085_v30  ;;  %v1094_v30 = vld [vmem:[%s1501_s7 + $0x10] sm:$0xff] }
  0x83   : > { %975 = vmatmul.msk.bf16.gmra.mxu0 %vm381_vm0, %v360_v32  ;;  %v1084_v32 = vld [vmem:[%s1499_s5] sm:$0xff] }
  0x84   : > { %695 = vmatpush.bf16.msra.mxu2 %v1084_v32 }
  0x90   : > { %v415_v34 = vpop.f32.mrf.mxu0 }
  0x91   : > { %v416_v36 = vadd.f32 %v1341_v35, %v415_v34 }
  0x93   : > { %1112 = vtanh.f32 %v416_v36 }
  0x98   : > { %v417_v37 = vpop.f32.mrf.mxu0 }
  0x99   : > { %v418_v38 = vadd.f32 %v1341_v35, %v417_v37  ;;  %v1113_v39 = vpop.eup %1112 }
  0x9b   : > { %1114 = vtanh.f32 %v418_v38 }
  0xa0   : > { %v420_v40 = vpop.f32.mrf.mxu0 }
  0xa1   : > { %v1115_v41 = vpop.eup %1114  ;;  %v421_v43 = vadd.f32 %v1341_v35, %v420_v40 }
  0xa2   : > { %v471_v42 = vpack.c.bf16 %v1115_v41, %v1113_v39 }
  0xa3   : > { %1116 = vtanh.f32 %v421_v43 }
  0xa4   : > { %555 = vmatmul.bf16.vlgmr.msra.gmra.mxu1 %v471_v42 }
  0xa8   : > { %v422_v44 = vpop.f32.mrf.mxu0 }
  0xa9   : > { %v423_v45 = vadd.f32 %v1341_v35, %v422_v44  ;;  %v1117_v46 = vpop.eup %1116 }
  0xab   : > { %1118 = vtanh.f32 %v423_v45 }
  0xb0   : > { %v425_v47 = vpop.f32.mrf.mxu0 }
  0xb1   : > { %v1119_v48 = vpop.eup %1118  ;;  %v426_v50 = vadd.f32 %v1341_v35, %v425_v47 }
  0xb2   : > { %v472_v49 = vpack.c.bf16 %v1119_v48, %v1117_v46 }
  0xb3   : > { %1120 = vtanh.f32 %v426_v50 }
  0xb4   : > { %560 = vmatmul.bf16.gmra.mxu1 %v472_v49 }
  0xb8   : > { %v427_v51 = vpop.f32.mrf.mxu0 }
  0xb9   : > { %v428_v52 = vadd.f32 %v1341_v35, %v427_v51  ;;  %v1121_v53 = vpop.eup %1120 }
  0xbb   : > { %1122 = vtanh.f32 %v428_v52 }
  0xc0   : > { %v430_v54 = vpop.f32.mrf.mxu0 }
  0xc1   : > { %v1123_v55 = vpop.eup %1122  ;;  %v431_v57 = vadd.f32 %v1341_v35, %v430_v54 }
  0xc2   : > { %v473_v56 = vpack.c.bf16 %v1123_v55, %v1121_v53 }
  0xc3   : > { %1124 = vtanh.f32 %v431_v57 }
  0xc4   : > { %565 = vmatmul.bf16.gmra.mxu1 %v473_v56 }
  0xc8   : > { %v432_v58 = vpop.f32.mrf.mxu0 }
  0xc9   : > { %v433_v59 = vadd.f32 %v1341_v35, %v432_v58  ;;  %v1125_v60 = vpop.eup %1124 }
  0xcb   : > { %1126 = vtanh.f32 %v433_v59 }
  0xd0   : > { %v435_v61 = vpop.f32.mrf.mxu0 }
  0xd1   : > { %v1127_v62 = vpop.eup %1126  ;;  %v436_v0 = vadd.f32 %v1341_v35, %v435_v61 }
  0xd2   : > { %v474_v63 = vpack.c.bf16 %v1127_v62, %v1125_v60 }
  0xd3   : > { %1128 = vtanh.f32 %v436_v0 }
  0xd4   : > { %570 = vmatmul.bf16.gmra.mxu1 %v474_v63 }
  0xd8   : > { %v437_v1 = vpop.f32.mrf.mxu0 }
  0xd9   : > { %v438_v2 = vadd.f32 %v1341_v35, %v437_v1  ;;  %v1129_v3 = vpop.eup %1128 }
  0xdb   : > { %1130 = vtanh.f32 %v438_v2 }
  0xe0   : > { %v440_v4 = vpop.f32.mrf.mxu0 }
  0xe1   : > { %v1131_v5 = vpop.eup %1130  ;;  %v441_v7 = vadd.f32 %v1341_v35, %v440_v4 }
  0xe2   : > { %v475_v6 = vpack.c.bf16 %v1131_v5, %v1129_v3 }
  0xe3   : > { %1132 = vtanh.f32 %v441_v7 }
  0xe4   : > { %575 = vmatmul.bf16.gmra.mxu1 %v475_v6 }
  0xe8   : > { %v442_v8 = vpop.f32.mrf.mxu0 }
  0xe9   : > { %v443_v9 = vadd.f32 %v1341_v35, %v442_v8  ;;  %v1133_v10 = vpop.eup %1132 }
  0xeb   : > { %1134 = vtanh.f32 %v443_v9 }
  0xf0   : > { %v445_v11 = vpop.f32.mrf.mxu0 }
  0xf1   : > { %v1135_v12 = vpop.eup %1134  ;;  %v446_v15 = vadd.f32 %v1341_v35, %v445_v11 }
  0xf2   : > { %v476_v13 = vpack.c.bf16 %v1135_v12, %v1133_v10 }
  0xf3   : > { %1136 = vtanh.f32 %v446_v15  ;;  %v1099_v15 = vld [vmem:[%s1501_s7 + $0x38] sm:$0xff] }
  0xf4   : > { %580 = vmatmul.bf16.gmra.mxu1 %v476_v13  ;;  %829 = vmatpush.bf16.msra.mxu3 %v1099_v15 }
  0xf8   : > { %v447_v17 = vpop.f32.mrf.mxu0 }
  0xf9   : > { %v448_v18 = vadd.f32 %v1341_v35, %v447_v17  ;;  %v1137_v20 = vpop.eup %1136  ;;  %v1098_v17 = vld [vmem:[%s1501_s7 + $0x30] sm:$0xff] }
  0xfa   : > { %830 = vmatpush.bf16.msra.mxu3 %v1098_v17 }
  0xfb   : > { %1138 = vtanh.f32 %v448_v18 }
 0x100   : > { %v450_v21 = vpop.f32.mrf.mxu0 }
 0x101   : > { %v1139_v23 = vpop.eup %1138  ;;  %v451_v26 = vadd.f32 %v1341_v35, %v450_v21 }
 0x102   : > { %v477_v24 = vpack.c.bf16 %v1139_v23, %v1137_v20  ;;  %v1097_v20 = vld [vmem:[%s1501_s7 + $0x28] sm:$0xff] }
 0x103   : > { %1140 = vtanh.f32 %v451_v26  ;;  %831 = vmatpush.bf16.msra.mxu3 %v1097_v20  ;;  %v1096_v26 = vld [vmem:[%s1501_s7 + $0x20] sm:$0xff] }
 0x104   : > { %585 = vmatmul.bf16.gmra.mxu1 %v477_v24 }
 0x107   : > { %832 = vmatpush.bf16.msra.mxu3 %v1096_v26 }
 0x108   : > { %v452_v27 = vpop.f32.mrf.mxu0 }
 0x109   : > { %v453_v29 = vadd.f32 %v1341_v35, %v452_v27  ;;  %v1141_v31 = vpop.eup %1140  ;;  %v1386_v35 = vld [vmem:[%s1498_s4] ss:$0 sm:$0xff] }
 0x10b   : > { %1142 = vtanh.f32 %v453_v29  ;;  %v1095_v29 = vld [vmem:[%s1501_s7 + $0x18] sm:$0xff] }
 0x10c   : > { %833 = vmatpush.bf16.msra.mxu3 %v1095_v29  ;;  %v1111_v29 = vld [vmem:[%s1502_s8] ss:$0 sm:$0xff] }
 0x110   : > { %834 = vmatpush.bf16.msra.mxu3 %v1094_v30 }
 0x111   : > { %v1143_v33 = vpop.eup %1142 }
 0x112   : > { %v478_v34 = vpack.c.bf16 %v1143_v33, %v1141_v31 }
 0x114   : > { %590 = vmatmul.bf16.gmra.mxu1 %v478_v34  ;;  %v1093_v34 = vld [vmem:[%s1501_s7 + $0x8] sm:$0xff] }
 0x115   : > { %835 = vmatpush.bf16.msra.mxu3 %v1093_v34 }
 0x121   : > { %v556_v36 = vpop.f32.mrf.mxu1 }
 0x122   : > { %v557_v37 = vadd.f32 %v1386_v35, %v556_v36  ;;  %v1092_v36 = vld [vmem:[%s1501_s7] sm:$0xff] }
 0x123   : > { %836 = vmatpush.bf16.msra.mxu3 %v1092_v36 }
 0x124   : > { %1144 = vtanh.f32 %v557_v37  ;;  %v1431_v37 = vld [vmem:[%s1500_s6] ss:$0 sm:$0xff] }
 0x129   : > { %v558_v38 = vpop.f32.mrf.mxu1 }
 0x12a   : > { %v559_v39 = vadd.f32 %v1386_v35, %v558_v38  ;;  %v1145_v40 = vpop.eup %1144 }
 0x12c   : > { %1146 = vtanh.f32 %v559_v39 }
 0x131   : > { %v561_v41 = vpop.f32.mrf.mxu1 }
 0x132   : > { %v1147_v42 = vpop.eup %1146  ;;  %v562_v44 = vadd.f32 %v1386_v35, %v561_v41 }
 0x133   : > { %v612_v43 = vpack.c.bf16 %v1147_v42, %v1145_v40 }
 0x134   : > { %1148 = vtanh.f32 %v562_v44 }
 0x135   : > { %696 = vmatmul.bf16.vlgmr.msra.gmra.mxu2 %v612_v43 }
 0x139   : > { %v563_v45 = vpop.f32.mrf.mxu1 }
 0x13a   : > { %v564_v46 = vadd.f32 %v1386_v35, %v563_v45  ;;  %v1149_v47 = vpop.eup %1148 }
 0x13c   : > { %1150 = vtanh.f32 %v564_v46 }
 0x141   : > { %v566_v48 = vpop.f32.mrf.mxu1 }
 0x142   : > { %v1151_v49 = vpop.eup %1150  ;;  %v567_v51 = vadd.f32 %v1386_v35, %v566_v48 }
 0x143   : > { %v613_v50 = vpack.c.bf16 %v1151_v49, %v1149_v47 }
 0x144   : > { %1152 = vtanh.f32 %v567_v51 }
 0x145   : > { %701 = vmatmul.bf16.gmra.mxu2 %v613_v50 }
 0x149   : > { %v568_v52 = vpop.f32.mrf.mxu1 }
 0x14a   : > { %v569_v53 = vadd.f32 %v1386_v35, %v568_v52  ;;  %v1153_v54 = vpop.eup %1152 }
 0x14c   : > { %1154 = vtanh.f32 %v569_v53 }
 0x151   : > { %v571_v55 = vpop.f32.mrf.mxu1 }
 0x152   : > { %v1155_v56 = vpop.eup %1154  ;;  %v572_v58 = vadd.f32 %v1386_v35, %v571_v55 }
 0x153   : > { %v614_v57 = vpack.c.bf16 %v1155_v56, %v1153_v54 }
 0x154   : > { %1156 = vtanh.f32 %v572_v58 }
 0x155   : > { %706 = vmatmul.bf16.gmra.mxu2 %v614_v57 }
 0x159   : > { %v573_v59 = vpop.f32.mrf.mxu1 }
 0x15a   : > { %v574_v60 = vadd.f32 %v1386_v35, %v573_v59  ;;  %v1157_v61 = vpop.eup %1156 }
 0x15c   : > { %1158 = vtanh.f32 %v574_v60 }
 0x161   : > { %v576_v62 = vpop.f32.mrf.mxu1 }
 0x162   : > { %v1159_v63 = vpop.eup %1158  ;;  %v577_v1 = vadd.f32 %v1386_v35, %v576_v62 }
 0x163   : > { %v615_v0 = vpack.c.bf16 %v1159_v63, %v1157_v61 }
 0x164   : > { %1160 = vtanh.f32 %v577_v1 }
 0x165   : > { %711 = vmatmul.bf16.gmra.mxu2 %v615_v0 }
 0x169   : > { %v578_v2 = vpop.f32.mrf.mxu1 }
 0x16a   : > { %v579_v3 = vadd.f32 %v1386_v35, %v578_v2  ;;  %v1161_v4 = vpop.eup %1160 }
 0x16c   : > { %1162 = vtanh.f32 %v579_v3 }
 0x171   : > { %v581_v5 = vpop.f32.mrf.mxu1 }
 0x172   : > { %v1163_v6 = vpop.eup %1162  ;;  %v582_v8 = vadd.f32 %v1386_v35, %v581_v5 }
 0x173   : > { %v616_v7 = vpack.c.bf16 %v1163_v6, %v1161_v4 }
 0x174   : > { %1164 = vtanh.f32 %v582_v8 }
 0x175   : > { %716 = vmatmul.bf16.gmra.mxu2 %v616_v7 }
 0x179   : > { %v583_v9 = vpop.f32.mrf.mxu1 }
 0x17a   : > { %v584_v10 = vadd.f32 %v1386_v35, %v583_v9  ;;  %v1165_v11 = vpop.eup %1164 }
 0x17c   : > { %1166 = vtanh.f32 %v584_v10 }
 0x181   : > { %v586_v12 = vpop.f32.mrf.mxu1 }
 0x182   : > { %v1167_v13 = vpop.eup %1166  ;;  %v587_v16 = vadd.f32 %v1386_v35, %v586_v12 }
 0x183   : > { %v617_v14 = vpack.c.bf16 %v1167_v13, %v1165_v11 }
 0x184   : > { %1168 = vtanh.f32 %v587_v16 }
 0x185   : > { %721 = vmatmul.bf16.gmra.mxu2 %v617_v14 }
 0x189   : > { %v588_v18 = vpop.f32.mrf.mxu1 }
 0x18a   : > { %v589_v19 = vadd.f32 %v1386_v35, %v588_v18  ;;  %v1169_v21 = vpop.eup %1168 }
 0x18c   : > { %1170 = vtanh.f32 %v589_v19 }
 0x191   : > { %v591_v22 = vpop.f32.mrf.mxu1 }
 0x192   : > { %v1171_v23 = vpop.eup %1170  ;;  %v592_v25 = vadd.f32 %v1386_v35, %v591_v22 }
 0x193   : > { %v618_v24 = vpack.c.bf16 %v1171_v23, %v1169_v21 }
 0x194   : > { %1172 = vtanh.f32 %v592_v25 }
 0x195   : > { %726 = vmatmul.bf16.gmra.mxu2 %v618_v24 }
 0x199   : > { %v593_v27 = vpop.f32.mrf.mxu1 }
 0x19a   : > { %v594_v28 = vadd.f32 %v1386_v35, %v593_v27  ;;  %v1173_v31 = vpop.eup %1172 }
 0x19c   : > { %1174 = vtanh.f32 %v594_v28 }
 0x1a2   : > { %v1175_v32 = vpop.eup %1174 }
 0x1a3   : > { %v619_v33 = vpack.c.bf16 %v1175_v32, %v1173_v31 }
 0x1a5   : > { %731 = vmatmul.bf16.gmra.mxu2 %v619_v33 }
 0x1b8   : > { %v697_v35 = vpop.f32.mrf.mxu2 }
 0x1b9   : > { %v698_v38 = vadd.f32 %v1431_v37, %v697_v35 }
 0x1bb   : > { %1176 = vtanh.f32 %v698_v38 }
 0x1c0   : > { %v699_v39 = vpop.f32.mrf.mxu2 }
 0x1c1   : > { %v700_v40 = vadd.f32 %v1431_v37, %v699_v39  ;;  %v1177_v41 = vpop.eup %1176 }
 0x1c3   : > { %1178 = vtanh.f32 %v700_v40 }
 0x1c8   : > { %v702_v42 = vpop.f32.mrf.mxu2 }
 0x1c9   : > { %v1179_v43 = vpop.eup %1178  ;;  %v703_v45 = vadd.f32 %v1431_v37, %v702_v42 }
 0x1ca   : > { %v753_v44 = vpack.c.bf16 %v1179_v43, %v1177_v41 }
 0x1cb   : > { %1180 = vtanh.f32 %v703_v45 }
 0x1cc   : > { %837 = vmatmul.bf16.vlgmr.msra.gmra.mxu3 %v753_v44 }
 0x1d0   : > { %v704_v46 = vpop.f32.mrf.mxu2 }
 0x1d1   : > { %v705_v47 = vadd.f32 %v1431_v37, %v704_v46  ;;  %v1181_v48 = vpop.eup %1180 }
 0x1d3   : > { %1182 = vtanh.f32 %v705_v47 }
 0x1d8   : > { %v707_v49 = vpop.f32.mrf.mxu2 }
 0x1d9   : > { %v1183_v50 = vpop.eup %1182  ;;  %v708_v52 = vadd.f32 %v1431_v37, %v707_v49 }
 0x1da   : > { %v754_v51 = vpack.c.bf16 %v1183_v50, %v1181_v48 }
 0x1db   : > { %1184 = vtanh.f32 %v708_v52 }
 0x1dc   : > { %842 = vmatmul.bf16.gmra.mxu3 %v754_v51 }
 0x1e0   : > { %v709_v53 = vpop.f32.mrf.mxu2 }
 0x1e1   : > { %v710_v54 = vadd.f32 %v1431_v37, %v709_v53  ;;  %v1185_v55 = vpop.eup %1184 }
 0x1e3   : > { %1186 = vtanh.f32 %v710_v54 }
 0x1e8   : > { %v712_v56 = vpop.f32.mrf.mxu2 }
 0x1e9   : > { %v1187_v57 = vpop.eup %1186  ;;  %v713_v59 = vadd.f32 %v1431_v37, %v712_v56 }
 0x1ea   : > { %v755_v58 = vpack.c.bf16 %v1187_v57, %v1185_v55 }
 0x1eb   : > { %1188 = vtanh.f32 %v713_v59 }
 0x1ec   : > { %847 = vmatmul.bf16.gmra.mxu3 %v755_v58 }
 0x1f0   : > { %v714_v60 = vpop.f32.mrf.mxu2 }
 0x1f1   : > { %v715_v61 = vadd.f32 %v1431_v37, %v714_v60  ;;  %v1189_v62 = vpop.eup %1188 }
 0x1f3   : > { %1190 = vtanh.f32 %v715_v61 }
 0x1f8   : > { %v717_v63 = vpop.f32.mrf.mxu2 }
 0x1f9   : > { %v1191_v0 = vpop.eup %1190  ;;  %v718_v2 = vadd.f32 %v1431_v37, %v717_v63 }
 0x1fa   : > { %v756_v1 = vpack.c.bf16 %v1191_v0, %v1189_v62 }
 0x1fb   : > { %1192 = vtanh.f32 %v718_v2 }
 0x1fc   : > { %852 = vmatmul.bf16.gmra.mxu3 %v756_v1 }
 0x200   : > { %v719_v3 = vpop.f32.mrf.mxu2 }
 0x201   : > { %v720_v4 = vadd.f32 %v1431_v37, %v719_v3  ;;  %v1193_v5 = vpop.eup %1192 }
 0x203   : > { %1194 = vtanh.f32 %v720_v4 }
 0x208   : > { %v722_v6 = vpop.f32.mrf.mxu2 }
 0x209   : > { %v1195_v7 = vpop.eup %1194  ;;  %v723_v9 = vadd.f32 %v1431_v37, %v722_v6 }
 0x20a   : > { %v757_v8 = vpack.c.bf16 %v1195_v7, %v1193_v5 }
 0x20b   : > { %1196 = vtanh.f32 %v723_v9 }
 0x20c   : > { %857 = vmatmul.bf16.gmra.mxu3 %v757_v8 }
 0x210   : > { %v724_v10 = vpop.f32.mrf.mxu2 }
 0x211   : > { %v725_v11 = vadd.f32 %v1431_v37, %v724_v10  ;;  %v1197_v12 = vpop.eup %1196 }
 0x213   : > { %1198 = vtanh.f32 %v725_v11 }
 0x218   : > { %v727_v13 = vpop.f32.mrf.mxu2 }
 0x219   : > { %v1199_v14 = vpop.eup %1198  ;;  %v728_v16 = vadd.f32 %v1431_v37, %v727_v13 }
 0x21a   : > { %v758_v15 = vpack.c.bf16 %v1199_v14, %v1197_v12 }
 0x21b   : > { %1200 = vtanh.f32 %v728_v16 }
 0x21c   : > { %862 = vmatmul.bf16.gmra.mxu3 %v758_v15 }
 0x220   : > { %v729_v17 = vpop.f32.mrf.mxu2 }
 0x221   : > { %v730_v18 = vadd.f32 %v1431_v37, %v729_v17  ;;  %v1201_v19 = vpop.eup %1200 }
 0x223   : > { %1202 = vtanh.f32 %v730_v18 }
 0x228   : > { %v732_v20 = vpop.f32.mrf.mxu2 }
 0x229   : > { %v1203_v21 = vpop.eup %1202  ;;  %v733_v23 = vadd.f32 %v1431_v37, %v732_v20 }
 0x22a   : > { %v759_v22 = vpack.c.bf16 %v1203_v21, %v1201_v19 }
 0x22b   : > { %1204 = vtanh.f32 %v733_v23 }
 0x22c   : > { %867 = vmatmul.bf16.gmra.mxu3 %v759_v22 }
 0x230   : > { %v734_v24 = vpop.f32.mrf.mxu2 }
 0x231   : > { %v735_v25 = vadd.f32 %v1431_v37, %v734_v24  ;;  %v1205_v26 = vpop.eup %1204 }
 0x233   : > { %1206 = vtanh.f32 %v735_v25 }
 0x239   : > { %v1207_v27 = vpop.eup %1206 }
 0x23a   : > { %v760_v28 = vpack.c.bf16 %v1207_v27, %v1205_v26 }
 0x23c   : > { %872 = vmatmul.bf16.gmra.mxu3 %v760_v28 }
 0x24f   : > { %v838_v30 = vpop.f32.mrf.mxu3 }
 0x250   : > { %v839_v31 = vadd.f32 %v1111_v29, %v838_v30 }
 0x252   : > { %879 = vst.msk [vmem:[%s1457_s24] sm:$0xff] %vm878_vm1, %v839_v31 }
 0x257   : > { %v840_v32 = vpop.f32.mrf.mxu3 }
 0x258   : > { %v841_v33 = vadd.f32 %v1111_v29, %v840_v32 }
 0x25a   : > { %880 = vst.msk [vmem:[%s1457_s24 + $0x8] sm:$0xff] %vm878_vm1, %v841_v33 }
 0x25f   : > { %v843_v34 = vpop.f32.mrf.mxu3 }
 0x260   : > { %v844_v36 = vadd.f32 %v1111_v29, %v843_v34 }
 0x262   : > { %881 = vst.msk [vmem:[%s1457_s24 + $0x10] sm:$0xff] %vm878_vm1, %v844_v36 }
 0x267   : > { %v845_v35 = vpop.f32.mrf.mxu3 }
 0x268   : > { %v846_v37 = vadd.f32 %v1111_v29, %v845_v35 }
 0x26a   : > { %882 = vst.msk [vmem:[%s1457_s24 + $0x18] sm:$0xff] %vm878_vm1, %v846_v37 }
 0x26f   : > { %v848_v38 = vpop.f32.mrf.mxu3 }
 0x270   : > { %v849_v39 = vadd.f32 %v1111_v29, %v848_v38 }
 0x272   : > { %883 = vst.msk [vmem:[%s1457_s24 + $0x20] sm:$0xff] %vm878_vm1, %v849_v39 }
 0x277   : > { %v850_v40 = vpop.f32.mrf.mxu3 }
 0x278   : > { %v851_v41 = vadd.f32 %v1111_v29, %v850_v40 }
 0x27a   : > { %884 = vst.msk [vmem:[%s1457_s24 + $0x28] sm:$0xff] %vm878_vm1, %v851_v41 }
 0x27f   : > { %v853_v42 = vpop.f32.mrf.mxu3 }
 0x280   : > { %v854_v43 = vadd.f32 %v1111_v29, %v853_v42 }
 0x282   : > { %885 = vst.msk [vmem:[%s1457_s24 + $0x30] sm:$0xff] %vm878_vm1, %v854_v43 }
 0x287   : > { %v855_v44 = vpop.f32.mrf.mxu3 }
 0x288   : > { %v856_v45 = vadd.f32 %v1111_v29, %v855_v44 }
 0x28a   : > { %886 = vst.msk [vmem:[%s1457_s24 + $0x38] sm:$0xff] %vm878_vm1, %v856_v45 }
 0x28f   : > { %v858_v46 = vpop.f32.mrf.mxu3 }
 0x290   : > { %v859_v47 = vadd.f32 %v1111_v29, %v858_v46 }
 0x292   : > { %887 = vst.msk [vmem:[%s1457_s24 + $0x40] sm:$0xff] %vm878_vm1, %v859_v47 }
 0x297   : > { %v860_v48 = vpop.f32.mrf.mxu3 }
 0x298   : > { %v861_v49 = vadd.f32 %v1111_v29, %v860_v48 }
 0x29a   : > { %888 = vst.msk [vmem:[%s1457_s24 + $0x48] sm:$0xff] %vm878_vm1, %v861_v49 }
 0x29f   : > { %v863_v50 = vpop.f32.mrf.mxu3 }
 0x2a0   : > { %v864_v51 = vadd.f32 %v1111_v29, %v863_v50 }
 0x2a2   : > { %889 = vst.msk [vmem:[%s1457_s24 + $0x50] sm:$0xff] %vm878_vm1, %v864_v51 }
 0x2a7   : > { %v865_v52 = vpop.f32.mrf.mxu3 }
 0x2a8   : > { %v866_v53 = vadd.f32 %v1111_v29, %v865_v52 }
 0x2aa   : > { %890 = vst.msk [vmem:[%s1457_s24 + $0x58] sm:$0xff] %vm878_vm1, %v866_v53 }
 0x2af   : > { %v868_v54 = vpop.f32.mrf.mxu3 }
 0x2b0   : > { %v869_v55 = vadd.f32 %v1111_v29, %v868_v54 }
 0x2b2   : > { %891 = vst.msk [vmem:[%s1457_s24 + $0x60] sm:$0xff] %vm878_vm1, %v869_v55 }
 0x2b7   : > { %v870_v56 = vpop.f32.mrf.mxu3 }
 0x2b8   : > { %v871_v57 = vadd.f32 %v1111_v29, %v870_v56 }
 0x2ba   : > { %892 = vst.msk [vmem:[%s1457_s24 + $0x68] sm:$0xff] %vm878_vm1, %v871_v57 }
 0x2bf   : > { %v873_v58 = vpop.f32.mrf.mxu3 }
 0x2c0   : > { %v874_v59 = vadd.f32 %v1111_v29, %v873_v58 }
 0x2c2   : > { %893 = vst.msk [vmem:[%s1457_s24 + $0x70] sm:$0xff] %vm878_vm1, %v874_v59 }
 0x2c7   : > { %v875_v60 = vpop.f32.mrf.mxu3 }
 0x2c8   : > { %v876_v61 = vadd.f32 %v1111_v29, %v875_v60 }
 0x2ca   : > { %894 = vst.msk [vmem:[%s1457_s24 + $0x78] sm:$0xff] %vm878_vm1, %v876_v61 }
 0x2cb PF: > { %s19_s30 = sadd.s32 1, %s1214_s30  }
 0x2cc   : > { %p16_p4 = scmp.ge.s32.totalorder %s19_s30, 4  }
 0x2ce   :  { %18 = sbr.rel (!%p16_p4) target bundleno = 1 (0x1), region = 86 }

</bundles_post_ra>
